<compile_context>
chip_gen: v7x
topology: tpu7x:2x2x1
jax: 0.10.0
libtpu: 0.0.40
codegen_flags: <defaults>
</compile_context>

<pallas_src>
import jax
import jax.numpy as jnp
from jax.experimental import pallas as pl
from jax.experimental.pallas import tpu as pltpu


def _round_up(x, m):
    return ((x + m - 1) // m) * m


def _linear_kernel(x_ref, wt_ref, b_ref, o_ref):
    # (TB, Cin) @ (Cin, Cout) on the MXU with f32 accumulation, bias add on VPU.
    acc = jnp.dot(x_ref[...], wt_ref[...], preferred_element_type=jnp.float32)
    o_ref[...] = (acc + b_ref[...]).astype(o_ref.dtype)


def prepare_params(weight, bias):
    """One-time parameter prep: W stored as (Cin, Cout), bias as (1, Cout).

    Call once at model-load time (persistent storage), not per forward call.
    """
    wt = jnp.asarray(weight).T                  # (Cin, Cout)
    bias2d = jnp.asarray(bias).reshape(1, -1)   # (1, Cout)
    return wt, bias2d


def last_layer_classifier_forward(x, wt, bias2d, *, tb=1024):
    """x: (B, Cin), wt: (Cin, Cout) pre-transposed, bias2d: (1, Cout) -> (B, Cout)."""
    B, Cin = x.shape
    Cin_w, Cout = wt.shape
    assert Cin == Cin_w, f"x feature dim {Cin} != weight dim {Cin_w}"
    assert bias2d.shape == (1, Cout)

    # ---- batch tile selection ----------------------------------------------
    TB = min(int(tb), B)
    if B >= 8:
        # Block dim must be a multiple of 8 sublanes unless it equals the full
        # array dim (guards the tb<8 lowering hazard).
        TB = max(8, (TB // 8) * 8)
    else:
        TB = B  # tiny batch: block equals the full batch dim
    # Give v7x's two TensorCores work on the ("parallel",) grid when B is big.
    if B >= 64 and pl.cdiv(B, TB) == 1:
        TB = max(8, _round_up(pl.cdiv(B, 2), 8))
    n_tiles = pl.cdiv(B, TB)  # ragged last tile is masked by Pallas, no jnp.pad

    # ---- explicit scoped-VMEM budget from buffer math ------------------------
    lane_cin = _round_up(Cin, 128)
    lane_cout = _round_up(Cout, 128)
    vmem_needed = (
        2 * TB * lane_cin * 4                       # x tile, double-buffered
        + 1 * _round_up(Cin, 8) * lane_cout * 4     # weight, single-buffered
        + 1 * 8 * lane_cout * 4                     # bias, single-buffered
        + 2 * TB * lane_cout * 4                    # out tile, double-buffered
        + (4 << 20)                                 # compiler-scratch headroom
    )
    vmem_limit = min(max(vmem_needed, 16 << 20), 48 << 20)

    return pl.pallas_call(
        _linear_kernel,
        out_shape=jax.ShapeDtypeStruct((B, Cout), x.dtype),
        grid=(n_tiles,),
        in_specs=[
            pl.BlockSpec((TB, Cin), lambda i: (i, 0)),           # x: pipelined
            pl.BlockSpec((Cin, Cout), lambda i: (0, 0),
                         pipeline_mode=pl.Buffered(1)),          # W: resident
            pl.BlockSpec((1, Cout), lambda i: (0, 0),
                         pipeline_mode=pl.Buffered(1)),          # b: resident
        ],
        out_specs=pl.BlockSpec((TB, Cout), lambda i: (i, 0)),
        compiler_params=pltpu.CompilerParams(
            dimension_semantics=("parallel",),
            vmem_limit_bytes=vmem_limit,
        ),
    )(x, wt, bias2d)


if __name__ == "__main__":
    # Module-consistent shapes: in_channel=1000, out_channel=20, small batch.
    in_channel = 1000
    out_channel = 20

    key = jax.random.PRNGKey(0)
    kw, kb, kx1, kx2 = jax.random.split(key, 4)

    # nn.Linear default init: U(-1/sqrt(fan_in), 1/sqrt(fan_in))
    bound = 1.0 / jnp.sqrt(jnp.float32(in_channel))
    weight = jax.random.uniform(kw, (out_channel, in_channel), jnp.float32, -bound, bound)
    bias = jax.random.uniform(kb, (out_channel,), jnp.float32, -bound, bound)

    # One-time persistent parameter prep (transpose + reshape).
    wt, bias2d = prepare_params(weight, bias)

    def reference(xx):
        return jnp.dot(xx, weight.T, precision=jax.lax.Precision.HIGHEST) + bias

    # Case 1: small batch (single tile; block equals the full batch dim).
    x1 = jax.random.normal(kx1, (8, in_channel), jnp.float32)
    y1 = jax.block_until_ready(last_layer_classifier_forward(x1, wt, bias2d))
    assert y1.shape == (8, out_channel)
    assert jnp.allclose(y1, reference(x1), atol=1e-3, rtol=1e-3)

    # Case 2: ragged batch (100 rows, TB=32 -> 4 tiles, last one masked).
    x2 = jax.random.normal(kx2, (100, in_channel), jnp.float32)
    y2 = jax.block_until_ready(last_layer_classifier_forward(x2, wt, bias2d, tb=32))
    assert y2.shape == (100, out_channel)
    assert jnp.allclose(y2, reference(x2), atol=1e-3, rtol=1e-3)

    print("KERNEL_OK")
</pallas_src>

<mosaic_0001>
module attributes {stable_mosaic.version = 11 : i64} {
  func.func @_linear_kernel(%arg0: i32, %arg1: memref<8x1000xf32, #tpu.memory_space<vmem>>, %arg2: memref<1000x20xf32, #tpu.memory_space<vmem>>, %arg3: memref<1x20xf32, #tpu.memory_space<vmem>>, %arg4: memref<8x20xf32, #tpu.memory_space<vmem>>) attributes {dimension_semantics = [#tpu.dimension_semantics<parallel>], iteration_bounds = array<i64: 1>, scalar_prefetch = 0 : i64, scratch_operands = 0 : i64, tpu.core_type = #tpu.core_type<tc>, window_params = [{transform_indices = @transform_0, window_bounds = array<i64: 8, 1000>}, {pipeline_mode = #tpu.pipeline_mode<synchronous>, transform_indices = @transform_1, window_bounds = array<i64: 1000, 20>}, {pipeline_mode = #tpu.pipeline_mode<synchronous>, transform_indices = @transform_2, window_bounds = array<i64: 1, 20>}, {transform_indices = @transform_3, window_bounds = array<i64: 8, 20>}]} {
    %c0 = arith.constant 0 : index
    %c0_0 = arith.constant 0 : index
    %0 = vector.load %arg1[%c0, %c0_0] : memref<8x1000xf32, #tpu.memory_space<vmem>>, vector<8x1000xf32>
    %c0_1 = arith.constant 0 : index
    %c0_2 = arith.constant 0 : index
    %1 = vector.load %arg2[%c0_1, %c0_2] : memref<1000x20xf32, #tpu.memory_space<vmem>>, vector<1000x20xf32>
    %cst = arith.constant dense<0.000000e+00> : vector<8x20xf32>
    %2 = tpu.matmul %0, %1, %cst {dimension_numbers = #tpu.dot_dimension_numbers<[1], [0], [0], [1], [0, 0, 1, 1], [], []>} : vector<8x1000xf32>, vector<1000x20xf32>, vector<8x20xf32> -> vector<8x20xf32>
    %c0_3 = arith.constant 0 : index
    %c0_4 = arith.constant 0 : index
    %3 = vector.load %arg3[%c0_3, %c0_4] : memref<1x20xf32, #tpu.memory_space<vmem>>, vector<1x20xf32>
    %4 = vector.broadcast %3 : vector<1x20xf32> to vector<8x20xf32>
    %5 = arith.addf %2, %4 : vector<8x20xf32>
    %c0_5 = arith.constant 0 : index
    %c0_6 = arith.constant 0 : index
    %6 = vector.load %arg4[%c0_5, %c0_6] : memref<8x20xf32, #tpu.memory_space<vmem>>, vector<8x20xf32>
    tpu.vector_store %arg4[%c0_5, %c0_6], %5 {strides = array<i32>} : memref<8x20xf32, #tpu.memory_space<vmem>>, vector<8x20xf32>,
    return
  }
  func.func @transform_0(%arg0: i32) -> (i32, i32) {
    %c0_i32 = arith.constant 0 : i32
    %c0_i32_0 = arith.constant 0 : i32
    return %arg0, %c0_i32 : i32, i32
  }
  func.func @transform_1(%arg0: i32) -> (i32, i32) {
    %c0_i32 = arith.constant 0 : i32
    %c0_i32_0 = arith.constant 0 : i32
    %c0_i32_1 = arith.constant 0 : i32
    return %c0_i32, %c0_i32_0 : i32, i32
  }
  func.func @transform_2(%arg0: i32) -> (i32, i32) {
    %c0_i32 = arith.constant 0 : i32
    %c0_i32_0 = arith.constant 0 : i32
    %c0_i32_1 = arith.constant 0 : i32
    return %c0_i32, %c0_i32_0 : i32, i32
  }
  func.func @transform_3(%arg0: i32) -> (i32, i32) {
    %c0_i32 = arith.constant 0 : i32
    %c0_i32_0 = arith.constant 0 : i32
    return %arg0, %c0_i32 : i32, i32
  }
}

</mosaic_0001>

<bundles_post_ra>
// kernel: tpu_custom_call.1
= control target key start
LH: loop header
LB: loop body
LE: loop exit
PB: predicated region body
PF: predicated region fallthrough
CT: control target
= control target key end

     0   :  { %vm155_vm0 = vcmask 850944   ;;  %s1178_s0 = inlined_call_operand.vmem [shape: f32[8,1000], index: 0, kind: input, shape index: {}]   ;;  %s1179_s1 = inlined_call_operand.vmem [shape: f32[1000,20], index: 1, kind: input, shape index: {}]   ;;  %s1180_s2 = inlined_call_operand.vmem [shape: f32[1,20], index: 2, kind: input, shape index: {}]   ;;  %s1181_s3 = inlined_call_operand.hbm [shape: f32[8,20], index: 3, kind: output, shape index: {}]  }
   0x1   :  { %v39_v0 = vld [vmem:[%s1179_s1 + $0x80] sm:$0xff]  ;;  %v40_v1 = vld [vmem:[%s1179_s1 + $0x88] sm:$0xff]  ;;  %v41_v11 = vld [vmem:[%s1179_s1 + $0x90] sm:$0xff] }
   0x2   :  { %v71_v2 = vld [vmem:[%s1179_s1 + $0x180] sm:$0xff]  ;;  %v562_v3 = vpack.c.bf16 %v40_v1, %v39_v0  ;;  %v72_v4 = vld [vmem:[%s1179_s1 + $0x188] sm:$0xff]  ;;  %v42_v13 = vld [vmem:[%s1179_s1 + $0x98] sm:$0xff] }
   0x3   :  { %v23_v5 = vld [vmem:[%s1179_s1] sm:$0xff]  ;;  %v24_v6 = vld [vmem:[%s1179_s1 + $0x8] sm:$0xff]  ;;  %v594_v7 = vpack.c.bf16 %v72_v4, %v71_v2  ;;  %v73_v14 = vld [vmem:[%s1179_s1 + $0x190] sm:$0xff]  ;;  %v566_v16 = vpack.c.bf16 %v42_v13, %v41_v11 }
   0x4   :  { %v564_v8 = vpack.c.bf16 %v24_v6, %v23_v5  ;;  %v55_v9 = vld [vmem:[%s1179_s1 + $0x100] sm:$0xff]  ;;  %v56_v10 = vld [vmem:[%s1179_s1 + $0x108] sm:$0xff]  ;;  %563 = vmatprep.subr.bf16.mxu0 %v562_v3  ;;  %v74_v15 = vld [vmem:[%s1179_s1 + $0x198] sm:$0xff] }
   0x5   :  { %v596_v12 = vpack.c.bf16 %v56_v10, %v55_v9  ;;  %595 = vmatprep.subr.bf16.mxu1 %v594_v7  ;;  %v598_v17 = vpack.c.bf16 %v74_v15, %v73_v14  ;;  %v25_v18 = vld [vmem:[%s1179_s1 + $0x10] sm:$0xff]  ;;  %v26_v19 = vld [vmem:[%s1179_s1 + $0x18] sm:$0xff]  ;;  %v43_v23 = vld [vmem:[%s1179_s1 + $0xa0] sm:$0xff] }
   0x6   :  { %565 = vmatpush3.bf16.msra.mxu0 %v564_v8  ;;  %v57_v20 = vld [vmem:[%s1179_s1 + $0x110] sm:$0xff]  ;;  %v568_v21 = vpack.c.bf16 %v26_v19, %v25_v18  ;;  %v58_v22 = vld [vmem:[%s1179_s1 + $0x118] sm:$0xff]  ;;  %v44_v24 = vld [vmem:[%s1179_s1 + $0xa8] sm:$0xff] }
   0x7   :  { %597 = vmatpush3.bf16.msra.mxu1 %v596_v12  ;;  %567 = vmatprep.subr.bf16.mxu0 %v566_v16  ;;  %v600_v25 = vpack.c.bf16 %v58_v22, %v57_v20  ;;  %v570_v26 = vpack.c.bf16 %v44_v24, %v43_v23  ;;  %v75_v27 = vld [vmem:[%s1179_s1 + $0x1a0] sm:$0xff]  ;;  %v76_v28 = vld [vmem:[%s1179_s1 + $0x1a8] sm:$0xff]  ;;  %v45_v35 = vld [vmem:[%s1179_s1 + $0xb0] sm:$0xff] }
   0x8   :  { %599 = vmatprep.subr.bf16.mxu1 %v598_v17  ;;  %v27_v29 = vld [vmem:[%s1179_s1 + $0x20] sm:$0xff]  ;;  %v602_v30 = vpack.c.bf16 %v76_v28, %v75_v27  ;;  %v28_v31 = vld [vmem:[%s1179_s1 + $0x28] sm:$0xff]  ;;  %v46_v36 = vld [vmem:[%s1179_s1 + $0xb8] sm:$0xff] }
   0x9   :  { %v59_v32 = vld [vmem:[%s1179_s1 + $0x120] sm:$0xff]  ;;  %v60_v33 = vld [vmem:[%s1179_s1 + $0x128] sm:$0xff]  ;;  %v572_v34 = vpack.c.bf16 %v28_v31, %v27_v29  ;;  %v77_v37 = vld [vmem:[%s1179_s1 + $0x1b0] sm:$0xff]  ;;  %v574_v39 = vpack.c.bf16 %v46_v36, %v45_v35 }
   0xa   :  { %569 = vmatpush3.bf16.msra.mxu0 %v568_v21  ;;  %v604_v38 = vpack.c.bf16 %v60_v33, %v59_v32  ;;  %v78_v40 = vld [vmem:[%s1179_s1 + $0x1b8] sm:$0xff]  ;;  %v29_v41 = vld [vmem:[%s1179_s1 + $0x30] sm:$0xff]  ;;  %v47_v46 = vld [vmem:[%s1179_s1 + $0xc0] sm:$0xff] }
   0xb   :  { %601 = vmatpush3.bf16.msra.mxu1 %v600_v25  ;;  %571 = vmatprep.subr.bf16.mxu0 %v570_v26  ;;  %v30_v42 = vld [vmem:[%s1179_s1 + $0x38] sm:$0xff]  ;;  %v606_v43 = vpack.c.bf16 %v78_v40, %v77_v37  ;;  %v61_v44 = vld [vmem:[%s1179_s1 + $0x130] sm:$0xff]  ;;  %v48_v47 = vld [vmem:[%s1179_s1 + $0xc8] sm:$0xff] }
   0xc   :  { %603 = vmatprep.subr.bf16.mxu1 %v602_v30  ;;  %v62_v45 = vld [vmem:[%s1179_s1 + $0x138] sm:$0xff]  ;;  %v79_v48 = vld [vmem:[%s1179_s1 + $0x1c0] sm:$0xff]  ;;  %v80_v49 = vld [vmem:[%s1179_s1 + $0x1c8] sm:$0xff]  ;;  %v576_v50 = vpack.c.bf16 %v30_v42, %v29_v41  ;;  %v578_v52 = vpack.c.bf16 %v48_v47, %v47_v46 }
   0xd   :  { %v608_v51 = vpack.c.bf16 %v62_v45, %v61_v44  ;;  %v31_v53 = vld [vmem:[%s1179_s1 + $0x40] sm:$0xff]  ;;  %v32_v54 = vld [vmem:[%s1179_s1 + $0x48] sm:$0xff]  ;;  %v610_v56 = vpack.c.bf16 %v80_v49, %v79_v48  ;;  %v49_v58 = vld [vmem:[%s1179_s1 + $0xd0] sm:$0xff] }
   0xe   :  { %573 = vmatpush3.bf16.msra.mxu0 %v572_v34  ;;  %v63_v55 = vld [vmem:[%s1179_s1 + $0x140] sm:$0xff]  ;;  %v64_v57 = vld [vmem:[%s1179_s1 + $0x148] sm:$0xff]  ;;  %v50_v59 = vld [vmem:[%s1179_s1 + $0xd8] sm:$0xff]  ;;  %v580_v62 = vpack.c.bf16 %v32_v54, %v31_v53 }
   0xf   :  { %605 = vmatpush3.bf16.msra.mxu1 %v604_v38  ;;  %575 = vmatprep.subr.bf16.mxu0 %v574_v39  ;;  %v81_v60 = vld [vmem:[%s1179_s1 + $0x1d0] sm:$0xff]  ;;  %v82_v61 = vld [vmem:[%s1179_s1 + $0x1d8] sm:$0xff]  ;;  %v612_v63 = vpack.c.bf16 %v64_v57, %v63_v55  ;;  %v582_v0 = vpack.c.bf16 %v50_v59, %v49_v58  ;;  %v51_v6 = vld [vmem:[%s1179_s1 + $0xe0] sm:$0xff] }
  0x10   :  { %607 = vmatprep.subr.bf16.mxu1 %v606_v43  ;;  %v33_v1 = vld [vmem:[%s1179_s1 + $0x50] sm:$0xff]  ;;  %v34_v2 = vld [vmem:[%s1179_s1 + $0x58] sm:$0xff]  ;;  %v614_v4 = vpack.c.bf16 %v82_v61, %v81_v60  ;;  %v52_v7 = vld [vmem:[%s1179_s1 + $0xe8] sm:$0xff] }
  0x11   :  { %v65_v3 = vld [vmem:[%s1179_s1 + $0x150] sm:$0xff]  ;;  %v66_v5 = vld [vmem:[%s1179_s1 + $0x158] sm:$0xff]  ;;  %v83_v8 = vld [vmem:[%s1179_s1 + $0x1e0] sm:$0xff]  ;;  %v584_v10 = vpack.c.bf16 %v34_v2, %v33_v1  ;;  %v586_v14 = vpack.c.bf16 %v52_v7, %v51_v6 }
  0x12   :  { %577 = vmatpush3.bf16.msra.mxu0 %v576_v50  ;;  %v84_v9 = vld [vmem:[%s1179_s1 + $0x1e8] sm:$0xff]  ;;  %v35_v11 = vld [vmem:[%s1179_s1 + $0x60] sm:$0xff]  ;;  %v616_v13 = vpack.c.bf16 %v66_v5, %v65_v3  ;;  %v18_v17 = vld [vmem:[%s1178_s0 + $0x18] sm:$0xff] }
  0x13   :  { %609 = vmatpush3.bf16.msra.mxu1 %v608_v51  ;;  %579 = vmatprep.subr.bf16.mxu0 %v578_v52  ;;  %v36_v12 = vld [vmem:[%s1179_s1 + $0x68] sm:$0xff]  ;;  %v67_v15 = vld [vmem:[%s1179_s1 + $0x160] sm:$0xff]  ;;  %v618_v18 = vpack.c.bf16 %v84_v9, %v83_v8  ;;  %v53_v20 = vld [vmem:[%s1179_s1 + $0xf0] sm:$0xff]  ;;  %v727_v51 = vmov 0.0|0.0  }
  0x14   :  { %611 = vmatprep.subr.bf16.mxu1 %v610_v56  ;;  %v16_v16 = vld [vmem:[%s1178_s0 + $0x8] sm:$0xff]  ;;  %v54_v21 = vld [vmem:[%s1179_s1 + $0xf8] sm:$0xff]  ;;  %v85_v22 = vld [vmem:[%s1179_s1 + $0x1f0] sm:$0xff]  ;;  %293 = vmatprep.mubr.f32.mxu1 %v18_v17  ;;  %v588_v24 = vpack.c.bf16 %v36_v12, %v35_v11 }
  0x15   :  { %v68_v19 = vld [vmem:[%s1179_s1 + $0x168] sm:$0xff]  ;;  %223 = vmatprep.mubr.f32.mxu0 %v16_v16  ;;  %v86_v23 = vld [vmem:[%s1179_s1 + $0x1f8] sm:$0xff]  ;;  %v590_v26 = vpack.c.bf16 %v54_v21, %v53_v20  ;;  %v37_v27 = vld [vmem:[%s1179_s1 + $0x70] sm:$0xff] }
  0x16   :  { %581 = vmatpush3.bf16.msra.mxu0 %v580_v62  ;;  %v620_v25 = vpack.c.bf16 %v68_v19, %v67_v15  ;;  %v38_v28 = vld [vmem:[%s1179_s1 + $0x78] sm:$0xff]  ;;  %v69_v29 = vld [vmem:[%s1179_s1 + $0x170] sm:$0xff]  ;;  %v622_v30 = vpack.c.bf16 %v86_v23, %v85_v22  ;;  %v103_v32 = vld [vmem:[%s1179_s1 + $0x280] sm:$0xff] }
  0x17   :  { %613 = vmatpush3.bf16.msra.mxu1 %v612_v63  ;;  %583 = vmatprep.subr.bf16.mxu0 %v582_v0  ;;  %v70_v31 = vld [vmem:[%s1179_s1 + $0x178] sm:$0xff]  ;;  %v104_v33 = vld [vmem:[%s1179_s1 + $0x288] sm:$0xff]  ;;  %v592_v34 = vpack.c.bf16 %v38_v28, %v37_v27  ;;  %v87_v37 = vld [vmem:[%s1179_s1 + $0x200] sm:$0xff] }
  0x18   :  { %615 = vmatprep.subr.bf16.mxu1 %v614_v4  ;;  %v624_v35 = vpack.c.bf16 %v70_v31, %v69_v29  ;;  %v626_v36 = vpack.c.bf16 %v104_v33, %v103_v32  ;;  %v88_v38 = vld [vmem:[%s1179_s1 + $0x208] sm:$0xff]  ;;  %v119_v39 = vld [vmem:[%s1179_s1 + $0x300] sm:$0xff]  ;;  %v105_v41 = vld [vmem:[%s1179_s1 + $0x290] sm:$0xff] }
  0x19   :  { %v120_v40 = vld [vmem:[%s1179_s1 + $0x308] sm:$0xff]  ;;  %v106_v42 = vld [vmem:[%s1179_s1 + $0x298] sm:$0xff]  ;;  %v15_v43 = vld [vmem:[%s1178_s0] sm:$0xff]  ;;  %v628_v45 = vpack.c.bf16 %v88_v38, %v87_v37 }
  0x1a   :  { %585 = vmatpush3.bf16.msra.mxu0 %v584_v10  ;;  %v17_v44 = vld [vmem:[%s1178_s0 + $0x10] sm:$0xff]  ;;  %v659_v46 = vpack.c.bf16 %v120_v40, %v119_v39  ;;  %v630_v47 = vpack.c.bf16 %v106_v42, %v105_v41  ;;  %v90_v49 = vld [vmem:[%s1179_s1 + $0x218] sm:$0xff]  ;;  %v107_v53 = vld [vmem:[%s1179_s1 + $0x2a0] sm:$0xff] }
  0x1b   :  { %617 = vmatpush3.bf16.msra.mxu1 %v616_v13  ;;  %587 = vmatprep.subr.bf16.mxu0 %v586_v14  ;;  %v89_v48 = vld [vmem:[%s1179_s1 + $0x210] sm:$0xff]  ;;  %v122_v52 = vld [vmem:[%s1179_s1 + $0x318] sm:$0xff]  ;;  %v108_v54 = vld [vmem:[%s1179_s1 + $0x2a8] sm:$0xff] }
  0x1c   :  { %619 = vmatprep.subr.bf16.mxu1 %v618_v18  ;;  %v121_v50 = vld [vmem:[%s1179_s1 + $0x310] sm:$0xff]  ;;  %v632_v55 = vpack.c.bf16 %v90_v49, %v89_v48  ;;  %v91_v56 = vld [vmem:[%s1179_s1 + $0x220] sm:$0xff]  ;;  %v634_v58 = vpack.c.bf16 %v108_v54, %v107_v53  ;;  %v92_v59 = vld [vmem:[%s1179_s1 + $0x228] sm:$0xff] }
  0x1d   :  { %v662_v57 = vpack.c.bf16 %v122_v52, %v121_v50  ;;  %v123_v60 = vld [vmem:[%s1179_s1 + $0x320] sm:$0xff]  ;;  %v124_v61 = vld [vmem:[%s1179_s1 + $0x328] sm:$0xff]  ;;  %v109_v62 = vld [vmem:[%s1179_s1 + $0x2b0] sm:$0xff]  ;;  %v636_v1 = vpack.c.bf16 %v92_v59, %v91_v56 }
  0x1e   :  { %589 = vmatpush3.bf16.msra.mxu0 %v588_v24  ;;  %v110_v63 = vld [vmem:[%s1179_s1 + $0x2b8] sm:$0xff]  ;;  %v20_v0 = vld [vmem:[%s1178_s0 + $0x28] sm:$0xff]  ;;  %v665_v2 = vpack.c.bf16 %v124_v61, %v123_v60  ;;  %v93_v4 = vld [vmem:[%s1179_s1 + $0x230] sm:$0xff] }
  0x1f   :  { %621 = vmatpush3.bf16.msra.mxu1 %v620_v25  ;;  %591 = vmatprep.subr.bf16.mxu0 %v590_v26  ;;  %v638_v3 = vpack.c.bf16 %v110_v63, %v109_v62  ;;  %v94_v5 = vld [vmem:[%s1179_s1 + $0x238] sm:$0xff]  ;;  %v125_v6 = vld [vmem:[%s1179_s1 + $0x330] sm:$0xff]  ;;  %v111_v8 = vld [vmem:[%s1179_s1 + $0x2c0] sm:$0xff] }
  0x20   :  { %623 = vmatprep.subr.bf16.mxu1 %v622_v30  ;;  %v126_v7 = vld [vmem:[%s1179_s1 + $0x338] sm:$0xff]  ;;  %v112_v9 = vld [vmem:[%s1179_s1 + $0x2c8] sm:$0xff]  ;;  %v640_v11 = vpack.c.bf16 %v94_v5, %v93_v4 }
  0x21   :  { %v22_v10 = vld [vmem:[%s1178_s0 + $0x38] sm:$0xff] }
  0x22   :  { %593 = vmatpush3.bf16.msra.mxu0 %v592_v34 }
  0x23   :  { %625 = vmatpush3.bf16.msra.mxu1 %v624_v35  ;;  %627 = vmatprep.subr.bf16.mxu0 %v626_v36 }
  0x24   :  { %658 = vmatprep.subr.bf16.mxu1 %v727_v51 }
  0x25   :  { %224 = vmatmul.mubr.f32.vlgmr.msra.gmra.mrb[0].mxu0 %v15_v43 }
  0x26   :  { %294 = vmatmul.mubr.f32.vlgmr.msra.gmra.mrb[0].mxu1 %v17_v44  ;;  %629 = vmatpush3.bf16.msra.mxu0 %v628_v45 }
  0x27   :  { %660 = vmatpush1.bf16.msra.mxu1 %v659_v46  ;;  %631 = vmatprep.subr.bf16.mxu0 %v630_v47 }
  0x28   :  { %661 = vmatprep.subr.bf16.mxu1 %v727_v51  ;;  %363 = vmatprep.mubr.f32.mxu0 %v20_v0 }
  0x29   :  { %456 = vmatprep.mubr.msk.f32.mxu1 %vm155_vm0, %v22_v10 }
  0x2a   :  { %633 = vmatpush3.bf16.msra.mxu0 %v632_v55 }
  0x2b   :  { %663 = vmatpush1.bf16.msra.mxu1 %v662_v57  ;;  %635 = vmatprep.subr.bf16.mxu0 %v634_v58 }
  0x2c   :  { %664 = vmatprep.subr.bf16.mxu1 %v727_v51 }
  0x2e   :  { %637 = vmatpush3.bf16.msra.mxu0 %v636_v1 }
  0x2f   :  { %8 = vsyncpa [#allocation3], 0  ;;  %666 = vmatpush1.bf16.msra.mxu1 %v665_v2  ;;  %639 = vmatprep.subr.bf16.mxu0 %v638_v3  ;;  %v668_v12 = vpack.c.bf16 %v126_v7, %v125_v6  ;;  %v642_v13 = vpack.c.bf16 %v112_v9, %v111_v8  ;;  %v95_v14 = vld [vmem:[%s1179_s1 + $0x240] sm:$0xff]  ;;  %v96_v15 = vld [vmem:[%s1179_s1 + $0x248] sm:$0xff]  ;;  %v728_v3 = vmov 0.0   ;;  %vm439_vm1 = vcmask 162816  }
  0x30   :  { %v127_v16 = vld [vmem:[%s1179_s1 + $0x340] sm:$0xff]  ;;  %667 = vmatprep.subr.bf16.mxu1 %v727_v51  ;;  %v128_v17 = vld [vmem:[%s1179_s1 + $0x348] sm:$0xff]  ;;  %v113_v18 = vld [vmem:[%s1179_s1 + $0x2d0] sm:$0xff]  ;;  %v644_v20 = vpack.c.bf16 %v96_v15, %v95_v14 }
  0x31   :  { %v114_v19 = vld [vmem:[%s1179_s1 + $0x2d8] sm:$0xff]  ;;  %v671_v21 = vpack.c.bf16 %v128_v17, %v127_v16  ;;  %v97_v23 = vld [vmem:[%s1179_s1 + $0x250] sm:$0xff]  ;;  %v115_v27 = vld [vmem:[%s1179_s1 + $0x2e0] sm:$0xff] }
  0x32   :  { %641 = vmatpush3.bf16.msra.mxu0 %v640_v11  ;;  %v646_v22 = vpack.c.bf16 %v114_v19, %v113_v18  ;;  %v98_v24 = vld [vmem:[%s1179_s1 + $0x258] sm:$0xff]  ;;  %v129_v25 = vld [vmem:[%s1179_s1 + $0x350] sm:$0xff]  ;;  %v116_v28 = vld [vmem:[%s1179_s1 + $0x2e8] sm:$0xff] }
  0x33   :  { %669 = vmatpush1.bf16.msra.mxu1 %v668_v12  ;;  %643 = vmatprep.subr.bf16.mxu0 %v642_v13  ;;  %v130_v26 = vld [vmem:[%s1179_s1 + $0x358] sm:$0xff]  ;;  %v648_v29 = vpack.c.bf16 %v98_v24, %v97_v23  ;;  %v650_v31 = vpack.c.bf16 %v116_v28, %v115_v27  ;;  %v99_v32 = vld [vmem:[%s1179_s1 + $0x260] sm:$0xff]  ;;  %v100_v33 = vld [vmem:[%s1179_s1 + $0x268] sm:$0xff] }
  0x34   :  { %670 = vmatprep.subr.bf16.mxu1 %v727_v51  ;;  %v674_v30 = vpack.c.bf16 %v130_v26, %v129_v25  ;;  %v131_v34 = vld [vmem:[%s1179_s1 + $0x360] sm:$0xff]  ;;  %v132_v35 = vld [vmem:[%s1179_s1 + $0x368] sm:$0xff]  ;;  %v117_v36 = vld [vmem:[%s1179_s1 + $0x2f0] sm:$0xff]  ;;  %v652_v38 = vpack.c.bf16 %v100_v33, %v99_v32 }
  0x35   :  { %v118_v37 = vld [vmem:[%s1179_s1 + $0x2f8] sm:$0xff]  ;;  %v677_v39 = vpack.c.bf16 %v132_v35, %v131_v34  ;;  %v101_v41 = vld [vmem:[%s1179_s1 + $0x270] sm:$0xff]  ;;  %v135_v47 = vld [vmem:[%s1179_s1 + $0x380] sm:$0xff] }
  0x36   :  { %645 = vmatpush3.bf16.msra.mxu0 %v644_v20  ;;  %v654_v40 = vpack.c.bf16 %v118_v37, %v117_v36  ;;  %v102_v42 = vld [vmem:[%s1179_s1 + $0x278] sm:$0xff]  ;;  %v133_v43 = vld [vmem:[%s1179_s1 + $0x370] sm:$0xff]  ;;  %v136_v48 = vld [vmem:[%s1179_s1 + $0x388] sm:$0xff] }
  0x37   :  { %672 = vmatpush1.bf16.msra.mxu1 %v671_v21  ;;  %647 = vmatprep.subr.bf16.mxu0 %v646_v22  ;;  %v134_v44 = vld [vmem:[%s1179_s1 + $0x378] sm:$0xff]  ;;  %v656_v45 = vpack.c.bf16 %v102_v42, %v101_v41  ;;  %v19_v49 = vld [vmem:[%s1178_s0 + $0x20] sm:$0xff]  ;;  %v683_v50 = vpack.c.bf16 %v136_v48, %v135_v47  ;;  %v137_v52 = vld [vmem:[%s1179_s1 + $0x390] sm:$0xff] }
  0x38   :  { %673 = vmatprep.subr.bf16.mxu1 %v727_v51  ;;  %v680_v46 = vpack.c.bf16 %v134_v44, %v133_v43  ;;  %v138_v53 = vld [vmem:[%s1179_s1 + $0x398] sm:$0xff]  ;;  %v139_v55 = vld [vmem:[%s1179_s1 + $0x3a0] sm:$0xff]  ;;  %v140_v56 = vld [vmem:[%s1179_s1 + $0x3a8] sm:$0xff] }
  0x39   :  { %v686_v54 = vpack.c.bf16 %v138_v53, %v137_v52  ;;  %v689_v57 = vpack.c.bf16 %v140_v56, %v139_v55  ;;  %v141_v58 = vld [vmem:[%s1179_s1 + $0x3b0] sm:$0xff]  ;;  %v142_v59 = vld [vmem:[%s1179_s1 + $0x3b8] sm:$0xff]  ;;  %v143_v61 = vld [vmem:[%s1179_s1 + $0x3c0] sm:$0xff] }
  0x3a   :  { %649 = vmatpush3.bf16.msra.mxu0 %v648_v29  ;;  %v692_v60 = vpack.c.bf16 %v142_v59, %v141_v58  ;;  %v144_v62 = vld [vmem:[%s1179_s1 + $0x3c8] sm:$0xff]  ;;  %v145_v0 = vld [vmem:[%s1179_s1 + $0x3d0] sm:$0xff]  ;;  %v146_v1 = vld [vmem:[%s1179_s1 + $0x3d8] sm:$0xff] }
  0x3b   :  { %675 = vmatpush1.bf16.msra.mxu1 %v674_v30  ;;  %651 = vmatprep.subr.bf16.mxu0 %v650_v31  ;;  %v695_v63 = vpack.c.bf16 %v144_v62, %v143_v61  ;;  %v698_v2 = vpack.c.bf16 %v146_v1, %v145_v0  ;;  %v147_v4 = vld [vmem:[%s1179_s1 + $0x3e0] sm:$0xff]  ;;  %v21_v5 = vld [vmem:[%s1178_s0 + $0x30] sm:$0xff]  ;;  %s729_s1 = smov [#allocation2]  }
  0x3c   :  { %676 = vmatprep.subr.bf16.mxu1 %v727_v51  ;;  %v455_v8 = vld [vmem:[%s1180_s2] ss:$0 sm:$0xff]  ;;  %s447_s0 = sshll.u32 %s729_s1, 4  ;;  %s448_s0 = int_to_ptr.vmem [resolvable:$true] %s447_s0 }
  0x3d   :  { %s703_s10 = scalar_lea.vmem %s448_s0, 128  ;;  %p708_p1 = scmp.lt.s32.totalorder %s448_s0, %s448_s0 }
  0x3e   :  { %653 = vmatpush3.bf16.msra.mxu0 %v652_v38  ;;  %p704_p0 = scmp.ne.s32.totalorder %s448_s0, %s703_s10  ;;  %p709_p2 = scmp.lt.s32.totalorder %s703_s10, %s703_s10 }
  0x3f   :  { %678 = vmatpush1.bf16.msra.mxu1 %v677_v39  ;;  %655 = vmatprep.subr.bf16.mxu0 %v654_v40 }
  0x40   :  { %679 = vmatprep.subr.bf16.mxu1 %v727_v51  ;;  %p710_p3 = por %p709_p2, %p708_p1 }
  0x42   :  { %657 = vmatpush3.bf16.msra.mxu0 %v656_v45  ;;  %p711_p4 = pnand %p710_p3, %p704_p0 }
  0x43   :  { %681 = vmatpush1.bf16.msra.mxu1 %v680_v46 }
  0x44   :  { %682 = vmatprep.subr.bf16.mxu1 %v727_v51 }
  0x45   :  { %364 = vmatmul.mubr.f32.vlgmr.msra.gmra.mrb[2].mxu0 %v19_v49 }
  0x47   :  { %684 = vmatpush1.bf16.msra.mxu1 %v683_v50 }
  0x48   :  { %685 = vmatprep.subr.bf16.mxu1 %v727_v51 }
  0x4b   :  { %687 = vmatpush1.bf16.msra.mxu1 %v686_v54 }
  0x4c   :  { %688 = vmatprep.subr.bf16.mxu1 %v727_v51 }
  0x4f   :  { %690 = vmatpush1.bf16.msra.mxu1 %v689_v57 }
  0x50   :  { %691 = vmatprep.subr.bf16.mxu1 %v727_v51 }
  0x53   :  { %693 = vmatpush1.bf16.msra.mxu1 %v692_v60 }
  0x54   :  { %694 = vmatprep.subr.bf16.mxu1 %v727_v51 }
  0x57   :  { %696 = vmatpush1.bf16.msra.mxu1 %v695_v63 }
  0x58   :  { %697 = vmatprep.subr.bf16.mxu1 %v727_v51 }
  0x5b   :  { %699 = vmatpush1.bf16.msra.mxu1 %v698_v2 }
  0x5c   :  { %425 = vmatprep.subr.mxu1 %v728_v3 }
  0x5f   :  { %426 = vmatpush1.msra.mxu1 %v147_v4 }
  0x60   :  { %434 = vmatmul.mubr.f32.vlgmr.msra.gmra.mrb[2].mxu1 %v21_v5 }
  0xf8   :  { %v489_v6 = vpop.f32.mrb[0].mxu0 }
  0xf9   :  { %v524_v7 = vpop.f32.mrb[0].mxu1  ;;  %v490_v51 = vpop.f32.mrb[1].mxu0 }
  0xfa   :  { %v491_v9 = vadd.f32 %v490_v51, %v489_v6  ;;  %v525_v10 = vpop.f32.mrb[1].mxu1 }
  0xfb   :  { %v526_v11 = vadd.f32 %v525_v10, %v524_v7 }
  0xfc   :  { %v226_v12 = vadd.f32 %v491_v9, %v455_v8 }
  0xfe   :  { %v296_v13 = vadd.f32 %v526_v11, %v226_v12 }
 0x118   :  { %v559_v14 = vpop.f32.mrb[2].mxu0 }
 0x119   :  { %v560_v15 = vpop.f32.mrb[3].mxu0 }
 0x11a   :  { %v561_v16 = vadd.f32 %v560_v15, %v559_v14 }
 0x11c   :  { %v366_v17 = vadd.f32 %v561_v16, %v296_v13 }
 0x133   :  { %v435_v18 = vpop.f32.mrb[2].mxu1 }
 0x134   :  { %v436_v19 = vadd.f32 %v435_v18, %v366_v17  ;;  %v437_v20 = vpop.f32.mrb[3].mxu1 }
 0x136   :  { %440 = vst.msk [vmem:[#allocation2] sm:$0xff] %vm439_vm1, %v436_v19 }
 0x137   :  { %714 = shalt.err (!%p711_p4)
}
 0x138   :  { %s715_s12 = scalar_lea.hbm %s1181_s3, 128 }
 0x139   :  { %p716_p5 = scmp.ne.s32.totalorder %s1181_s3, %s715_s12  ;;  %p719_p6 = scmp.lt.u32.totalorder %s715_s12, %s1181_s3 }
 0x13b   :  { %p721_p7 = pnand %p719_p6, %p716_p5 }
 0x13d   :  { %724 = shalt.err (!%p721_p7)
}
 0x13e   :  { %450 = dma.vmem_to_hbm [thread:$0]  %s448_s0, 128, %s1181_s3, [#allocation3]  }
 0x13f   :  { %725 = dma.done.wait [#allocation3], 128  }
 0x140   :  { %726 = vsyncadd [#allocation3], 4294967168 }
 0x141   :  { %454 = vsyncpa [#allocation3], 1 }

</bundles_post_ra>
